<compile_context>
chip_gen: v7x
topology: tpu7x:2x2x1
jax: 0.10.0
libtpu: 0.0.40
codegen_flags: <defaults>
</compile_context>

<pallas_src>
import jax
import jax.numpy as jnp
from jax import lax
from jax.experimental import pallas as pl
from jax.experimental.pallas import tpu as pltpu

_LANE = 128            # batch tiles are multiples of the 128-lane vreg width
_SUBLANE = 8
_VMEM_LIMIT = 32 * 1024 * 1024    # explicit scoped-VMEM limit (v5e default is 16 MiB)
_VMEM_BUDGET = 24 * 1024 * 1024   # per-step working-set budget (headroom under the limit)


def _round_up(x, m):
    return (x + m - 1) // m * m


def _critic_kernel(x_ref, w1_ref, b1_ref, w2_ref, b2_ref, w3_ref, b3_ref, o_ref):
    """One batch tile, fully resident in VMEM.

    x arrives in its natural (tile, obs) layout; batch is kept on the lane
    (last) axis for every intermediate and for the (1, tile) output row, so
    stores are unmasked lane-dense `vst`s.
    """
    x = x_ref[...]                                                    # (tile, obs) f32
    # Layer 1 (MXU, NT form): (64, obs) . (tile, obs)^T -> (64, tile), f32 acc.
    z1 = lax.dot_general(w1_ref[...], x, (((1,), (1,)), ((), ())),
                         preferred_element_type=jnp.float32) + b1_ref[...]
    h1 = jnp.tanh(z1).astype(w2_ref.dtype)                            # (64, tile) bf16
    # Layer 2 (MXU): (32, 64) @ (64, tile) -> (32, tile), f32 acc.
    z2 = jnp.dot(w2_ref[...], h1, preferred_element_type=jnp.float32) + b2_ref[...]
    h2 = jnp.tanh(z2)                                                 # (32, tile) f32
    # Layer 3 (VPU mul + XLU sublane reduce): a 1-row MXU matmul would waste a
    # whole systolic pass + result-FIFO drain; the reduce rides the idle XLU.
    out = jnp.sum(w3_ref[...] * h2, axis=0, keepdims=True) + b3_ref[...]
    o_ref[...] = out.astype(o_ref.dtype)                              # (1, tile)


def _max_tile_for_vmem(obs_dim, budget_bytes):
    """Largest lane-multiple batch tile whose per-step working set fits budget."""
    x_cols = _round_up(obs_dim, _LANE)        # VMEM pads the minor dim to 128 lanes
    bytes_per_col = (
        2 * x_cols * 4                        # x tile (f32), double-buffered
        + 2 * _SUBLANE * 4                    # (1, tile) f32 output, double-buffered
        + 64 * 4 + 64 * 2                     # z1 (f32) + h1 (bf16)
        + 32 * 4 + 32 * 4                     # z2 (f32) + h2 (f32)
    )
    return max((budget_bytes // bytes_per_col) // _LANE * _LANE, _LANE)


def critic_forward(x, params, *, batch_tile=8192, hidden_dtype=jnp.bfloat16):
    """Critic forward pass.

    x: (B, obs_dim) float32 in its natural layout.
    params: torch-layout weights w{1,2,3}: (out, in) and biases b{1,2,3}: (out, 1).
    Returns (B, 1) float32.
    """
    B, obs_dim = x.shape
    if batch_tile <= 0 or batch_tile % _LANE != 0:
        raise ValueError(f"batch_tile must be a positive multiple of {_LANE}")

    # Tile selection:
    #  * <= batch_tile,
    #  * <= ceil(B/2) rounded to a lane multiple, so the "parallel" grid keeps
    #    >= 2 steps and both v7x TensorCores get work,
    #  * <= the largest tile the honest per-step VMEM accounting allows.
    tile = min(batch_tile,
               _round_up(pl.cdiv(B, 2), _LANE),
               _max_tile_for_vmem(obs_dim, _VMEM_BUDGET))
    tile = max(tile, _LANE)
    # Last tile may be partial: out-of-range input rows are padded (garbage,
    # column-independent) and out-of-range output lanes are masked on store.
    n_tiles = pl.cdiv(B, tile)

    # Weights / biases (~3 KiB total) stay resident via constant index_maps.
    w1 = params["w1"].astype(jnp.float32)                 # (64, obs)  f32 (x stays f32)
    b1 = params["b1"].astype(jnp.float32)                 # (64, 1)
    w2 = params["w2"].astype(hidden_dtype)                # (32, 64)   bf16, matches h1
    b2 = params["b2"].astype(jnp.float32)                 # (32, 1)
    w3 = params["w3"].reshape(-1, 1).astype(jnp.float32)  # (32, 1)    column for VPU head
    b3 = params["b3"].astype(jnp.float32)                 # (1, 1)

    def replicated(a):
        return pl.BlockSpec(a.shape, lambda i: (0, 0))

    out = pl.pallas_call(
        _critic_kernel,
        out_shape=jax.ShapeDtypeStruct((1, B), jnp.float32),
        grid_spec=pltpu.PrefetchScalarGridSpec(
            num_scalar_prefetch=0,
            grid=(n_tiles,),
            in_specs=[
                pl.BlockSpec((tile, obs_dim), lambda i: (i, 0)),   # x, natural layout
                replicated(w1), replicated(b1),
                replicated(w2), replicated(b2),
                replicated(w3), replicated(b3),
            ],
            out_specs=pl.BlockSpec((1, tile), lambda i: (0, i)),   # lane-dense row
        ),
        compiler_params=pltpu.CompilerParams(
            # Independent batch tiles -> shard across v7x's 2 TensorCores.
            dimension_semantics=("parallel",),
            vmem_limit_bytes=_VMEM_LIMIT,
        ),
    )(x.astype(jnp.float32), w1, b1, w2, b2, w3, b3)

    return out.reshape(B, 1)


def init_critic_params(key, obs_dim):
    """Synthetic params in torch layout: W as (out, in), b as (out, 1) columns."""
    k1, k2, k3, k4, k5, k6 = jax.random.split(key, 6)
    s = 0.1
    return {
        "w1": s * jax.random.normal(k1, (64, obs_dim), jnp.float32),
        "b1": s * jax.random.normal(k2, (64, 1), jnp.float32),
        "w2": s * jax.random.normal(k3, (32, 64), jnp.float32),
        "b2": s * jax.random.normal(k4, (32, 1), jnp.float32),
        "w3": s * jax.random.normal(k5, (1, 32), jnp.float32),
        "b3": s * jax.random.normal(k6, (1, 1), jnp.float32),
    }


def critic_reference(x, params):
    """Pure-JAX f32 reference matching torch nn.Sequential semantics."""
    h1 = jnp.tanh(x @ params["w1"].T + params["b1"][:, 0])
    h2 = jnp.tanh(h1 @ params["w2"].T + params["b2"][:, 0])
    return h2 @ params["w3"].T + params["b3"][:, 0]


if __name__ == "__main__":
    key = jax.random.PRNGKey(0)
    k_param, k_x1, k_x2, k_x3 = jax.random.split(key, 4)

    obs_dim = 8                       # e.g. 8-dim vectorized-env observation
    params = init_critic_params(k_param, obs_dim)

    # 1) Tiny batch: single partial tile (B < one 128-lane tile).
    x_small = jax.random.normal(k_x1, (8, obs_dim), jnp.float32)
    out_small = jax.block_until_ready(critic_forward(x_small, params))
    ref_small = critic_reference(x_small, params)
    assert out_small.shape == (8, 1)
    assert jnp.allclose(out_small, ref_small, atol=2e-2, rtol=2e-2), \
        "small-batch mismatch vs reference"

    # 2) Non-lane-multiple batch: multi-tile grid with a masked partial last tile.
    x_mid = jax.random.normal(k_x2, (1000, obs_dim), jnp.float32)
    out_mid = jax.block_until_ready(critic_forward(x_mid, params, batch_tile=512))
    ref_mid = critic_reference(x_mid, params)
    assert out_mid.shape == (1000, 1)
    assert jnp.allclose(out_mid, ref_mid, atol=2e-2, rtol=2e-2), \
        "partial-tile mismatch vs reference"

    # 3) Larger even batch: multi-step "parallel" grid of full tiles.
    x_big = jax.random.normal(k_x3, (4096, obs_dim), jnp.float32)
    out_big = jax.block_until_ready(critic_forward(x_big, params, batch_tile=1024))
    ref_big = critic_reference(x_big, params)
    assert out_big.shape == (4096, 1)
    assert jnp.allclose(out_big, ref_big, atol=2e-2, rtol=2e-2), \
        "tiled-batch mismatch vs reference"

    print("KERNEL_OK")
</pallas_src>

<mosaic_0001>
module attributes {stable_mosaic.version = 11 : i64} {
  func.func @_critic_kernel(%arg0: i32, %arg1: memref<128x8xf32, #tpu.memory_space<vmem>>, %arg2: memref<64x8xf32, #tpu.memory_space<vmem>>, %arg3: memref<64x1xf32, #tpu.memory_space<vmem>>, %arg4: memref<32x64xbf16, #tpu.memory_space<vmem>>, %arg5: memref<32x1xf32, #tpu.memory_space<vmem>>, %arg6: memref<32x1xf32, #tpu.memory_space<vmem>>, %arg7: memref<1x1xf32, #tpu.memory_space<vmem>>, %arg8: memref<1x128xf32, #tpu.memory_space<vmem>>) attributes {dimension_semantics = [#tpu.dimension_semantics<parallel>], iteration_bounds = array<i64: 1>, scalar_prefetch = 0 : i64, scratch_operands = 0 : i64, tpu.core_type = #tpu.core_type<tc>, window_params = [{transform_indices = @transform_0, window_bounds = array<i64: 128, 8>}, {pipeline_mode = #tpu.pipeline_mode<synchronous>, transform_indices = @transform_1, window_bounds = array<i64: 64, 8>}, {pipeline_mode = #tpu.pipeline_mode<synchronous>, transform_indices = @transform_2, window_bounds = array<i64: 64, 1>}, {pipeline_mode = #tpu.pipeline_mode<synchronous>, transform_indices = @transform_3, window_bounds = array<i64: 32, 64>}, {pipeline_mode = #tpu.pipeline_mode<synchronous>, transform_indices = @transform_4, window_bounds = array<i64: 32, 1>}, {pipeline_mode = #tpu.pipeline_mode<synchronous>, transform_indices = @transform_5, window_bounds = array<i64: 32, 1>}, {pipeline_mode = #tpu.pipeline_mode<synchronous>, transform_indices = @transform_6, window_bounds = array<i64: 1, 1>}, {transform_indices = @transform_7, window_bounds = array<i64: 1, 128>}]} {
    %c0 = arith.constant 0 : index
    %c0_0 = arith.constant 0 : index
    %0 = vector.load %arg1[%c0, %c0_0] : memref<128x8xf32, #tpu.memory_space<vmem>>, vector<128x8xf32>
    %c0_1 = arith.constant 0 : index
    %c0_2 = arith.constant 0 : index
    %1 = vector.load %arg2[%c0_1, %c0_2] : memref<64x8xf32, #tpu.memory_space<vmem>>, vector<64x8xf32>
    %cst = arith.constant dense<0.000000e+00> : vector<64x128xf32>
    %2 = tpu.matmul %1, %0, %cst {dimension_numbers = #tpu.dot_dimension_numbers<[1], [1], [0], [0], [0, 0, 1, 0], [], []>} : vector<64x8xf32>, vector<128x8xf32>, vector<64x128xf32> -> vector<64x128xf32>
    %c0_3 = arith.constant 0 : index
    %c0_4 = arith.constant 0 : index
    %3 = vector.load %arg3[%c0_3, %c0_4] : memref<64x1xf32, #tpu.memory_space<vmem>>, vector<64x1xf32>
    %4 = vector.broadcast %3 : vector<64x1xf32> to vector<64x128xf32>
    %5 = arith.addf %2, %4 : vector<64x128xf32>
    %6 = math.tanh %5 : vector<64x128xf32>
    %7 = arith.truncf %6 : vector<64x128xf32> to vector<64x128xbf16>
    %c0_5 = arith.constant 0 : index
    %c0_6 = arith.constant 0 : index
    %8 = vector.load %arg4[%c0_5, %c0_6] : memref<32x64xbf16, #tpu.memory_space<vmem>>, vector<32x64xbf16>
    %cst_7 = arith.constant dense<0.000000e+00> : vector<32x128xf32>
    %9 = tpu.matmul %8, %7, %cst_7 {dimension_numbers = #tpu.dot_dimension_numbers<[1], [0], [0], [1], [0, 0, 1, 1], [], []>} : vector<32x64xbf16>, vector<64x128xbf16>, vector<32x128xf32> -> vector<32x128xf32>
    %c0_8 = arith.constant 0 : index
    %c0_9 = arith.constant 0 : index
    %10 = vector.load %arg5[%c0_8, %c0_9] : memref<32x1xf32, #tpu.memory_space<vmem>>, vector<32x1xf32>
    %11 = vector.broadcast %10 : vector<32x1xf32> to vector<32x128xf32>
    %12 = arith.addf %9, %11 : vector<32x128xf32>
    %13 = math.tanh %12 : vector<32x128xf32>
    %c0_10 = arith.constant 0 : index
    %c0_11 = arith.constant 0 : index
    %14 = vector.load %arg6[%c0_10, %c0_11] : memref<32x1xf32, #tpu.memory_space<vmem>>, vector<32x1xf32>
    %15 = vector.broadcast %14 : vector<32x1xf32> to vector<32x128xf32>
    %16 = arith.mulf %15, %13 : vector<32x128xf32>
    %cst_12 = arith.constant dense<0.000000e+00> : vector<128xf32>
    %17 = vector.multi_reduction <add>, %16, %cst_12 [0] : vector<32x128xf32> to vector<128xf32>
    %18 = vector.shape_cast %17 : vector<128xf32> to vector<1x128xf32>
    %c0_13 = arith.constant 0 : index
    %c0_14 = arith.constant 0 : index
    %19 = vector.load %arg7[%c0_13, %c0_14] : memref<1x1xf32, #tpu.memory_space<vmem>>, vector<1x1xf32>
    %20 = vector.broadcast %19 : vector<1x1xf32> to vector<1x128xf32>
    %21 = arith.addf %18, %20 : vector<1x128xf32>
    %c0_15 = arith.constant 0 : index
    %c0_16 = arith.constant 0 : index
    %22 = vector.load %arg8[%c0_15, %c0_16] : memref<1x128xf32, #tpu.memory_space<vmem>>, vector<1x128xf32>
    tpu.vector_store %arg8[%c0_15, %c0_16], %21 {strides = array<i32>} : memref<1x128xf32, #tpu.memory_space<vmem>>, vector<1x128xf32>,
    return
  }
  func.func @transform_0(%arg0: i32) -> (i32, i32) {
    %c0_i32 = arith.constant 0 : i32
    %c0_i32_0 = arith.constant 0 : i32
    return %arg0, %c0_i32 : i32, i32
  }
  func.func @transform_1(%arg0: i32) -> (i32, i32) {
    %c0_i32 = arith.constant 0 : i32
    %c0_i32_0 = arith.constant 0 : i32
    %c0_i32_1 = arith.constant 0 : i32
    return %c0_i32, %c0_i32_0 : i32, i32
  }
  func.func @transform_2(%arg0: i32) -> (i32, i32) {
    %c0_i32 = arith.constant 0 : i32
    %c0_i32_0 = arith.constant 0 : i32
    %c0_i32_1 = arith.constant 0 : i32
    return %c0_i32, %c0_i32_0 : i32, i32
  }
  func.func @transform_3(%arg0: i32) -> (i32, i32) {
    %c0_i32 = arith.constant 0 : i32
    %c0_i32_0 = arith.constant 0 : i32
    %c0_i32_1 = arith.constant 0 : i32
    return %c0_i32, %c0_i32_0 : i32, i32
  }
  func.func @transform_4(%arg0: i32) -> (i32, i32) {
    %c0_i32 = arith.constant 0 : i32
    %c0_i32_0 = arith.constant 0 : i32
    %c0_i32_1 = arith.constant 0 : i32
    return %c0_i32, %c0_i32_0 : i32, i32
  }
  func.func @transform_5(%arg0: i32) -> (i32, i32) {
    %c0_i32 = arith.constant 0 : i32
    %c0_i32_0 = arith.constant 0 : i32
    %c0_i32_1 = arith.constant 0 : i32
    return %c0_i32, %c0_i32_0 : i32, i32
  }
  func.func @transform_6(%arg0: i32) -> (i32, i32) {
    %c0_i32 = arith.constant 0 : i32
    %c0_i32_0 = arith.constant 0 : i32
    %c0_i32_1 = arith.constant 0 : i32
    return %c0_i32, %c0_i32_0 : i32, i32
  }
  func.func @transform_7(%arg0: i32) -> (i32, i32) {
    %c0_i32 = arith.constant 0 : i32
    %c0_i32_0 = arith.constant 0 : i32
    return %c0_i32, %arg0 : i32, i32
  }
}

</mosaic_0001>

<bundles_post_ra>
// kernel: tpu_custom_call.1
= control target key start
LH: loop header
LB: loop body
LE: loop exit
PB: predicated region body
PF: predicated region fallthrough
CT: control target
= control target key end

     0   :  { %s900_s0 = inlined_call_operand.vmem [shape: f32[8,8], index: 0, kind: input, shape index: {}]   ;;  %s901_s1 = inlined_call_operand.vmem [shape: f32[64,8], index: 1, kind: input, shape index: {}]   ;;  %s902_s2 = inlined_call_operand.vmem [shape: f32[64,1], index: 2, kind: input, shape index: {}]   ;;  %s903_s3 = inlined_call_operand.vmem [shape: bf16[32,64], index: 3, kind: input, shape index: {}]   ;;  %s904_s4 = inlined_call_operand.vmem [shape: f32[32,1], index: 4, kind: input, shape index: {}]   ;;  %s905_s5 = inlined_call_operand.vmem [shape: f32[32,1], index: 5, kind: input, shape index: {}]   ;;  %s906_s6 = inlined_call_operand.<no memory space> [shape: f32[1,1], index: 6, kind: input, shape index: {}]   ;;  %s907_s7 = inlined_call_operand.hbm [shape: f32[1,8], index: 7, kind: output, shape index: {}]  }
   0x1   :  { %v12_v0 = vstv %s906_s6 }
   0x2   :  { %13 = vst [vmem:[#allocation2] sm:$0x1] %v12_v0 }
   0x3   :  { %v30_v1 = vld [vmem:[%s900_s0] sm:$0xff]  ;;  %v31_v2 = vld [vmem:[%s900_s0 + $0x8] sm:$0xff]  ;;  %vm102_vm0 = vcmask 64512   ;;  %v32_v3 = vld [vmem:[%s900_s0 + $0x10] sm:$0xff]  ;;  %v669_v7 = vmov 0  }
   0x4   :  { %v567_v4 = vpack.c.bf16 %v31_v2, %v30_v1  ;;  %vm725_vm1 = vmpackc.low %vm102_vm0, %vm102_vm0  ;;  %v33_v6 = vld [vmem:[%s900_s0 + $0x18] sm:$0xff]  ;;  %617 = vset.pattern.permute.xlu0 %v669_v7  ;;  %618 = vset.pattern.permute.xlu1 %v669_v7  ;;  %v46_v9 = vld [vmem:[%s901_s1] sm:$0xff] }
   0x5   :  { %v573_v8 = vpack.c.bf16 %v33_v6, %v32_v3  ;;  %v34_v10 = vld [vmem:[%s900_s0 + $0x20] sm:$0xff]  ;;  %v35_v11 = vld [vmem:[%s900_s0 + $0x28] sm:$0xff]  ;;  %543 = vmatprep.mubr.msk.f32.mxu0 %vm102_vm0, %v46_v9  ;;  %v56_v14 = vld [vmem:[%s902_s2 + $0x10] sm:$0xff] }
   0x6   :  { %569 = vmatprep.subr.msk.bf16.mxu0 %vm725_vm1, %v567_v4  ;;  %v54_v12 = vld [vmem:[%s902_s2] sm:$0xff]  ;;  %v579_v13 = vpack.c.bf16 %v35_v11, %v34_v10  ;;  %v55_v15 = vld [vmem:[%s902_s2 + $0x8] sm:$0xff]  ;;  %74 = vperm.xlu1 %618, %v56_v14   ;;  %v57_v16 = vld [vmem:[%s902_s2 + $0x18] sm:$0xff] }
   0x7   :  { %572 = vmatpush3.bf16.xpose.msk.msra.mxu0 %vm725_vm1, %v567_v4  ;;  %64 = vperm.xlu0 %617, %v54_v12   ;;  %v36_v17 = vld [vmem:[%s900_s0 + $0x30] sm:$0xff]  ;;  %v37_v18 = vld [vmem:[%s900_s0 + $0x38] sm:$0xff]  ;;  %v58_v19 = vld [vmem:[%s902_s2 + $0x20] sm:$0xff] }
   0x8   :  { %575 = vmatprep.subr.msk.bf16.mxu0 %vm725_vm1, %v573_v8  ;;  %v59_v20 = vld [vmem:[%s902_s2 + $0x28] sm:$0xff] }
   0xa   :  { %79 = vperm.xlu1 %618, %v57_v16  }
   0xb   :  { %69 = vperm.xlu0 %617, %v55_v15  }
   0xf   :  { %578 = vmatpush3.bf16.xpose.msk.msra.mxu0 %vm725_vm1, %v573_v8 }
  0x10   :  { %581 = vmatprep.subr.msk.bf16.mxu0 %vm725_vm1, %v579_v13 }
  0x11   :  { %14 = vsyncpa [#allocation4], 0  ;;  %v585_v21 = vpack.c.bf16 %v37_v18, %v36_v17  ;;  %84 = vperm.xlu0 %617, %v58_v19   ;;  %v60_v22 = vld [vmem:[%s902_s2 + $0x30] sm:$0xff]  ;;  %89 = vperm.xlu1 %618, %v59_v20   ;;  %v61_v23 = vld [vmem:[%s902_s2 + $0x38] sm:$0xff]  ;;  %vm330_vm2 = vcmask 523264  }
  0x12   :  { %v38_v24 = vld [vmem:[%s900_s0 + $0x40] sm:$0xff]  ;;  %v39_v25 = vld [vmem:[%s900_s0 + $0x48] sm:$0xff]  ;;  %v298_v29 = vld [vmem:[%s904_s4 + $0x10] sm:$0xff] }
  0x13   :  { %v296_v26 = vld [vmem:[%s904_s4] sm:$0xff]  ;;  %v297_v27 = vld [vmem:[%s904_s4 + $0x8] sm:$0xff]  ;;  %v591_v28 = vpack.c.bf16 %v39_v25, %v38_v24  ;;  %v299_v30 = vld [vmem:[%s904_s4 + $0x18] sm:$0xff] }
  0x14   :  { %v40_v31 = vld [vmem:[%s900_s0 + $0x50] sm:$0xff]  ;;  %v41_v32 = vld [vmem:[%s900_s0 + $0x58] sm:$0xff]  ;;  %v390_v33 = vld [vmem:[%s905_s5] sm:$0xff] }
  0x15   :  { %94 = vperm.xlu0 %617, %v60_v22   ;;  %99 = vperm.xlu1 %618, %v61_v23   ;;  %v391_v34 = vld [vmem:[%s905_s5 + $0x8] sm:$0xff]  ;;  %v597_v35 = vpack.c.bf16 %v41_v32, %v40_v31  ;;  %v392_v36 = vld [vmem:[%s905_s5 + $0x10] sm:$0xff]  ;;  %v393_v37 = vld [vmem:[%s905_s5 + $0x18] sm:$0xff] }
  0x16   :  { %v42_v38 = vld [vmem:[%s900_s0 + $0x60] sm:$0xff]  ;;  %v43_v39 = vld [vmem:[%s900_s0 + $0x68] sm:$0xff]  ;;  %v44_v42 = vld [vmem:[%s900_s0 + $0x70] sm:$0xff] }
  0x17   :  { %584 = vmatpush3.bf16.xpose.msk.msra.mxu0 %vm725_vm1, %v579_v13  ;;  %v427_v40 = vld [vmem:[#allocation2] sm:$0x1]  ;;  %v603_v41 = vpack.c.bf16 %v43_v39, %v42_v38  ;;  %v45_v43 = vld [vmem:[%s900_s0 + $0x78] sm:$0xff]  ;;  %v47_v45 = vld [vmem:[%s901_s1 + $0x8] sm:$0xff] }
  0x18   :  { %587 = vmatprep.subr.msk.bf16.mxu0 %vm725_vm1, %v585_v21  ;;  %v609_v44 = vpack.c.bf16 %v45_v43, %v44_v42  ;;  %v48_v46 = vld [vmem:[%s901_s1 + $0x10] sm:$0xff]  ;;  %v49_v47 = vld [vmem:[%s901_s1 + $0x18] sm:$0xff]  ;;  %v50_v48 = vld [vmem:[%s901_s1 + $0x20] sm:$0xff] }
  0x19   :  { %302 = vperm.xlu0 %617, %v296_v26   ;;  %307 = vperm.xlu1 %618, %v297_v27   ;;  %v51_v49 = vld [vmem:[%s901_s1 + $0x28] sm:$0xff]  ;;  %v52_v50 = vld [vmem:[%s901_s1 + $0x30] sm:$0xff]  ;;  %v53_v51 = vld [vmem:[%s901_s1 + $0x38] sm:$0xff] }
  0x1a   :  { %v619_v52 = vld [vmem:[%s903_s3] sm:$0xff]   ;;  %v620_v25 = vld [vmem:[%s903_s3 + $0x8] sm:$0xff]   ;;  %s670_s3 = smov [#allocation3]  }
  0x1b   :  { %563 = vmatprep.mubr.msk.bf16.mxu1 %vm330_vm2, %v619_v52  ;;  %v433_v52 = vlaneseq  ;;  %s445_s8 = sshll.u32 %s670_s3, 4  ;;  %s446_s8 = int_to_ptr.vmem [resolvable:$true] %s445_s8 }
  0x1c   :  { %s645_s6 = scalar_lea.vmem %s446_s8, 16  ;;  %s649_s9 = scalar_lea.vmem %s446_s8, 32 }
  0x1d   :  { %312 = vperm.xlu0 %617, %v298_v29   ;;  %317 = vperm.xlu1 %618, %v299_v30   ;;  %p646_p0 = scmp.ne.s32.totalorder %s446_s8, %s645_s6  ;;  %p650_p1 = scmp.lt.s32.totalorder %s446_s8, %s446_s8 }
  0x1e   :  { %p651_p2 = scmp.lt.s32.totalorder %s649_s9, %s645_s6 }
  0x1f   :  { %590 = vmatpush3.bf16.xpose.msk.msra.mxu0 %vm725_vm1, %v585_v21 }
  0x20   :  { %593 = vmatprep.subr.msk.bf16.mxu0 %vm725_vm1, %v591_v28  ;;  %p652_p3 = por %p651_p2, %p650_p1 }
  0x21   :  { %396 = vperm.xlu0 %617, %v390_v33   ;;  %401 = vperm.xlu1 %618, %v391_v34  }
  0x22   :  { %p653_p4 = pnand %p652_p3, %p646_p0 }
  0x25   :  { %406 = vperm.xlu0 %617, %v392_v36   ;;  %411 = vperm.xlu1 %618, %v393_v37  }
  0x27   :  { %596 = vmatpush3.bf16.xpose.msk.msra.mxu0 %vm725_vm1, %v591_v28 }
  0x28   :  { %599 = vmatprep.subr.msk.bf16.mxu0 %vm725_vm1, %v597_v35 }
  0x29   :  { %430 = vperm.xlu0 %617, %v427_v40  }
  0x2f   :  { %602 = vmatpush3.bf16.xpose.msk.msra.mxu0 %vm725_vm1, %v597_v35 }
  0x30   :  { %605 = vmatprep.subr.msk.bf16.mxu0 %vm725_vm1, %v603_v41 }
  0x37   :  { %608 = vmatpush3.bf16.xpose.msk.msra.mxu0 %vm725_vm1, %v603_v41 }
  0x38   :  { %611 = vmatprep.subr.msk.bf16.mxu0 %vm725_vm1, %v609_v44 }
  0x3f   :  { %614 = vmatpush3.bf16.xpose.msk.msra.mxu0 %vm725_vm1, %v609_v44 }
  0x46   :  { %544 = vmatmul.mubr.msk.f32.vlgmr.msra.gmra.mrb[0].mxu0 %vm102_vm0, %v47_v45 }
  0x47   :  { %546 = vmatprep.mubr.msk.f32.mxu0 %vm102_vm0, %v48_v46 }
  0x4a   :  { %547 = vmatmul.mubr.msk.f32.gmra.mrb[2].mxu0 %vm102_vm0, %v49_v47 }
  0x4b   :  { %549 = vmatprep.mubr.msk.f32.mxu0 %vm102_vm0, %v50_v48 }
  0x4e   :  { %550 = vmatmul.mubr.msk.f32.gmra.mrb[4].mxu0 %vm102_vm0, %v51_v49 }
  0x4f   :  { %552 = vmatprep.mubr.msk.f32.mxu0 %vm102_vm0, %v52_v50 }
  0x52   :  { %553 = vmatmul.mubr.msk.f32.gmra.mrb[6].mxu0 %vm102_vm0, %v53_v51 }
  0x85   :  { %v75_v54 = vpop.permute.xlu1 %74 }
  0x86   :  { %v65_v53 = vpop.permute.xlu0 %64 }
  0x89   :  { %v80_v56 = vpop.permute.xlu1 %79 }
  0x8a   :  { %v70_v55 = vpop.permute.xlu0 %69 }
  0x90   :  { %v90_v0 = vpop.permute.xlu1 %89  ;;  %v85_v2 = vpop.permute.xlu0 %84 }
  0x94   :  { %v100_v7 = vpop.permute.xlu1 %99  ;;  %v95_v10 = vpop.permute.xlu0 %94 }
  0x98   :  { %v303_v26 = vpop.permute.xlu0 %302  ;;  %v308_v27 = vpop.permute.xlu1 %307 }
  0x9c   :  { %v313_v28 = vpop.permute.xlu0 %312  ;;  %v318_v34 = vpop.permute.xlu1 %317 }
  0xa0   :  { %v397_v38 = vpop.permute.xlu0 %396  ;;  %v402_v40 = vpop.permute.xlu1 %401 }
  0xa4   :  { %v407_v46 = vpop.permute.xlu0 %406  ;;  %v412_v49 = vpop.permute.xlu1 %411 }
 0x119   :  { %v545_v57 = vpop.f32.mrb[0].mxu0 }
 0x11a   :  { %v247_v58 = vadd.f32 %v545_v57, %v70_v55  ;;  %v241_v59 = vpop.f32.mrb[1].mxu0  ;;  %v434_v55 = vshrl.u32 %v433_v52, 7 }
 0x11b   :  { %v242_v60 = vadd.f32 %v241_v59, %v65_v53 }
 0x11c   :  { %621 = vtanh.f32 %v247_v58  ;;  %v435_v58 = vsub.s32 0, %v434_v55 }
 0x11d   :  { %623 = vtanh.f32 %v242_v60  ;;  %v548_v61 = vpop.f32.mrb[2].mxu0  ;;  %v431_v60 = vpop.permute.xlu0 %430 }
 0x11e   :  { %v257_v62 = vadd.f32 %v548_v61, %v80_v56  ;;  %v251_v63 = vpop.f32.mrb[3].mxu0 }
 0x11f   :  { %v252_v1 = vadd.f32 %v251_v63, %v75_v54 }
 0x120   :  { %625 = vtanh.f32 %v257_v62  ;;  %v436_v62 = vrot.slane %v431_v60, %v435_v58 }
 0x121   :  { %627 = vtanh.f32 %v252_v1  ;;  %v551_v3 = vpop.f32.mrb[4].mxu0 }
 0x122   :  { %v267_v4 = vadd.f32 %v551_v3, %v90_v0  ;;  %v261_v5 = vpop.f32.mrb[5].mxu0 }
 0x123   :  { %v262_v6 = vadd.f32 %v261_v5, %v85_v2 }
 0x124   :  { %629 = vtanh.f32 %v267_v4 }
 0x125   :  { %631 = vtanh.f32 %v262_v6  ;;  %v554_v8 = vpop.f32.mrb[6].mxu0 }
 0x126   :  { %v622_v9 = vpop.eup %621  ;;  %v277_v11 = vadd.f32 %v554_v8, %v100_v7  ;;  %v271_v12 = vpop.f32.mrb[7].mxu0 }
 0x127   :  { %v624_v13 = vpop.eup %623  ;;  %v272_v14 = vadd.f32 %v271_v12, %v95_v10 }
 0x128   :  { %633 = vtanh.f32 %v277_v11  ;;  %v288_v15 = vpack.c.bf16 %v622_v9, %v624_v13 }
 0x129   :  { %635 = vtanh.f32 %v272_v14 }
 0x12a   :  { %v626_v16 = vpop.eup %625  ;;  %555 = vmatprep.subr.bf16.mxu1 %v288_v15 }
 0x12b   :  { %v628_v17 = vpop.eup %627  ;;  %556 = vmatpush3.bf16.msra.mxu1 %v288_v15 }
 0x12c   :  { %v289_v18 = vpack.c.bf16 %v626_v16, %v628_v17 }
 0x12e   :  { %v630_v19 = vpop.eup %629  ;;  %557 = vmatprep.subr.bf16.mxu1 %v289_v18 }
 0x12f   :  { %v632_v20 = vpop.eup %631  ;;  %558 = vmatpush3.bf16.msra.mxu1 %v289_v18 }
 0x130   :  { %v290_v21 = vpack.c.bf16 %v630_v19, %v632_v20 }
 0x132   :  { %v634_v22 = vpop.eup %633  ;;  %559 = vmatprep.subr.bf16.mxu1 %v290_v21 }
 0x133   :  { %v636_v23 = vpop.eup %635  ;;  %560 = vmatpush3.bf16.msra.mxu1 %v290_v21 }
 0x134   :  { %v291_v24 = vpack.c.bf16 %v634_v22, %v636_v23 }
 0x136   :  { %561 = vmatprep.subr.bf16.mxu1 %v291_v24 }
 0x137   :  { %562 = vmatpush3.bf16.msra.mxu1 %v291_v24 }
 0x13a   :  { %564 = vmatmul.mubr.msk.bf16.vlgmr.msra.gmra.mrb[0].mxu1 %vm330_vm2, %v620_v25 }
 0x20d   :  { %v565_v29 = vpop.f32.mrb[0].mxu1 }
 0x20e   :  { %v380_v30 = vadd.f32 %v565_v29, %v313_v28  ;;  %v371_v31 = vpop.f32.mrb[1].mxu1 }
 0x20f   :  { %v372_v32 = vadd.f32 %v371_v31, %v303_v26  ;;  %v566_v33 = vpop.f32.mrb[2].mxu1 }
 0x210   :  { %v374_v35 = vpop.f32.mrb[3].mxu1  ;;  %v383_v36 = vadd.f32 %v566_v33, %v318_v34 }
 0x211   :  { %637 = vtanh.f32 %v372_v32  ;;  %v375_v37 = vadd.f32 %v374_v35, %v308_v27 }
 0x212   :  { %639 = vtanh.f32 %v380_v30 }
 0x213   :  { %641 = vtanh.f32 %v375_v37 }
 0x214   :  { %643 = vtanh.f32 %v383_v36 }
 0x21b   :  { %v638_v39 = vpop.eup %637 }
 0x21c   :  { %v640_v41 = vpop.eup %639  ;;  %v414_v43 = vmul.f32 %v638_v39, %v397_v38 }
 0x21d   :  { %v642_v42 = vpop.eup %641  ;;  %v416_v47 = vmul.f32 %v640_v41, %v407_v46 }
 0x21e   :  { %v415_v44 = vmul.f32 %v642_v42, %v402_v40  ;;  %v644_v45 = vpop.eup %643 }
 0x21f   :  { %v417_v50 = vmul.f32 %v644_v45, %v412_v49 }
 0x220   :  { %v418_v48 = vadd.f32 %v415_v44, %v414_v43 }
 0x222   :  { %v419_v51 = vadd.f32 %v418_v48, %v416_v47 }
 0x224   :  { %v420_v53 = vadd.f32 %v419_v51, %v417_v50 }
 0x226   :  { %v421_v54 = vrot.slane %v420_v53, 4 }
 0x228   :  { %v422_v56 = vadd.f32 %v421_v54, %v420_v53 }
 0x22a   :  { %v423_v57 = vrot.slane %v422_v56, 2 }
 0x22c   :  { %v424_v59 = vadd.f32 %v423_v57, %v422_v56 }
 0x22e   :  { %v425_v61 = vrot.slane %v424_v59, 1 }
 0x230   :  { %v426_v63 = vadd.f32 %v425_v61, %v424_v59 }
 0x232   :  { %v437_v0 = vadd.f32 %v436_v62, %v426_v63 }
 0x234   :  { %438 = vst [vmem:[#allocation3] sm:$0x1] %v437_v0 }
 0x235   :  { %656 = shalt.err (!%p653_p4)
}
 0x236   :  { %s657_s12 = scalar_lea.hbm %s907_s7, 16 }
 0x237   :  { %p658_p5 = scmp.ne.s32.totalorder %s907_s7, %s657_s12  ;;  %p661_p6 = scmp.lt.u32.totalorder %s657_s12, %s907_s7 }
 0x239   :  { %p663_p7 = pnand %p661_p6, %p658_p5 }
 0x23b   :  { %666 = shalt.err (!%p663_p7)
}
 0x23c   :  { %448 = dma.vmem_to_hbm [thread:$0]  %s446_s8, 16, %s907_s7, [#allocation4]  }
 0x23d   :  { %667 = dma.done.wait [#allocation4], 16  }
 0x23e   :  { %668 = vsyncadd [#allocation4], 4294967280 }
 0x23f   :  { %452 = vsyncpa [#allocation4], 1 }

</bundles_post_ra>
